<compile_context>
chip_gen: v7x
topology: tpu7x:2x2x1
jax: 0.10.0
libtpu: 0.0.40
codegen_flags: <defaults>
</compile_context>

<pallas_src>
import numpy as np
import jax
import jax.numpy as jnp
from jax import lax
from jax.experimental import pallas as pl
from jax.experimental.pallas import tpu as pltpu

DIM = 48
HEADS = 6
POINTS = 4
LEVELS = 1
HEAD_DIM = DIM // HEADS
RATIO = 1.0
D_VALUE = int(DIM * RATIO)
EPS = 1e-6
INIT_VALUES = 1.0  # module default is 0.0; nonzero chosen so the attn path is exercised


def _layernorm(x, w, b):
    mu = jnp.mean(x, axis=-1, keepdims=True)
    xc = x - mu
    var = jnp.mean(xc * xc, axis=-1, keepdims=True)
    return xc * lax.rsqrt(var + EPS) * w + b


# --------------------------- prologue: value projection ---------------------------
# Batch-only kernel: feat LayerNorm + value projection, hoisted out of the q-tiled
# main kernel so it is computed once per batch element (not once per q-tile).
def value_proj_kernel(f_ref, fn_w, fn_b, w_val, b_val, o_ref):
    fn = _layernorm(f_ref[0], fn_w[...], fn_b[...])
    o_ref[0] = jnp.dot(fn, w_val[...], preferred_element_type=jnp.float32) + b_val[...]


# --------------------------------- main kernel ------------------------------------
def injector_kernel(ss_ref,                       # scalar prefetch: (LEVELS, 2) i32 in SMEM
                    q_ref, rp_ref, val_ref,       # per-(batch, q-tile) inputs
                    qn_w, qn_b, w_qproj, b_qproj,
                    w_out, b_out, gsum_ref, gamma_ref,
                    o_ref):                       # (1, TQ, DIM) output
    lin = val_ref.shape[1]
    npnt = HEADS * POINTS                          # 24 sampling points

    q = q_ref[0]          # (TQ, DIM)
    rp = rp_ref[0]        # (TQ, 2)   normalized (x, y)
    value = val_ref[0]    # (Lin, D_VALUE)

    qn = _layernorm(q, qn_w[...], qn_b[...])

    # Fused query-side projection (one MXU launch); columns pre-permuted in the
    # wrapper to [x-offsets | y-offsets | logits] so each group is a contiguous slice.
    qproj = jnp.dot(qn.astype(jnp.bfloat16), w_qproj[...].astype(jnp.bfloat16),
                    preferred_element_type=jnp.float32) + b_qproj[...]
    offs_x = qproj[:, 0:npnt]               # (TQ, 24)
    offs_y = qproj[:, npnt:2 * npnt]        # (TQ, 24)
    logits = qproj[:, 2 * npnt:3 * npnt]    # (TQ, 24)

    h_i = ss_ref[0, 0]
    w_i = ss_ref[0, 1]
    h_f = h_i.astype(jnp.float32)
    w_f = w_i.astype(jnp.float32)

    # Batched softmax over each head's 4 points (exact): the row-wise max is a
    # constant within every group, group sums come from one tiny block-diagonal
    # (24, 24) matmul on the MXU, normalization by exact division (cheap at 24 lanes).
    e = jnp.exp(logits - jnp.max(logits, axis=-1, keepdims=True))
    denom = jnp.dot(e, gsum_ref[...], preferred_element_type=jnp.float32)
    aw = e / denom                                              # (TQ, 24)

    # Vectorized sampling-location / bilinear-weight prep for all 24 points (f32).
    # grid_sample(align_corners=False, padding_mode='zeros'): pixel = loc*size - 0.5,
    # and loc*size = rp*size + raw_offset  (folds away the divide by (w, h)).
    px = rp[:, 0:1] * w_f + offs_x - 0.5
    py = rp[:, 1:2] * h_f + offs_y - 0.5
    x0 = jnp.floor(px)
    y0 = jnp.floor(py)
    wx1 = px - x0
    wx0 = 1.0 - wx1
    wy1 = py - y0
    wy0 = 1.0 - wy1
    x0i = x0.astype(jnp.int32)
    x1i = x0i + 1
    y0i = y0.astype(jnp.int32)
    y1i = y0i + 1
    vx0 = (x0i >= 0) & (x0i < w_i)
    vx1 = (x1i >= 0) & (x1i < w_i)
    vy0 = (y0i >= 0) & (y0i < h_i)
    vy1 = (y1i >= 0) & (y1i < h_i)
    # Final per-corner weights: bilinear * softmax attention * zero-padding validity.
    # OOB corners (e.g. x = -1) alias in-range pixels through idx = y*w + x, so the
    # mask must stay on the weight.
    w00 = jnp.where(vx0 & vy0, wx0 * wy0 * aw, 0.0)
    w10 = jnp.where(vx1 & vy0, wx1 * wy0 * aw, 0.0)
    w01 = jnp.where(vx0 & vy1, wx0 * wy1 * aw, 0.0)
    w11 = jnp.where(vx1 & vy1, wx1 * wy1 * aw, 0.0)
    idx00 = y0i * w_i + x0i
    idx10 = y0i * w_i + x1i
    idx01 = y1i * w_i + x0i
    idx11 = y1i * w_i + x1i
    corners = ((idx00, w00), (idx10, w10), (idx01, w01), (idx11, w11))

    # Broadcast iota kept at (1, Lin) -> tiny persistent vreg footprint.
    hw_iota = lax.broadcasted_iota(jnp.int32, (1, lin), 1)
    value_bf = value.astype(jnp.bfloat16)
    w_out_bf = w_out[...].astype(jnp.bfloat16)

    attn = None
    for h in range(HEADS):
        # Sparse gather-weight matrix for this head; f32 build, cast once for the MXU.
        # TODO(synk): build acc directly in bf16 on v6e/v7x (bf16 VALU) to halve the
        # select/add passes and the acc footprint; keep the f32 build on v5e.
        acc = None
        for p in range(POINTS):
            col = h * POINTS + p
            for idx, wgt in corners:
                hit = jnp.where(hw_iota == idx[:, col:col + 1],
                                wgt[:, col:col + 1], 0.0)        # (TQ, Lin) single select
                acc = hit if acc is None else acc + hit
        # Fold the head's slice of the output projection into its value tile: the
        # gather matmul's output widens 8 -> 48 lanes at the same MXU pass count and
        # the per-head epilogue matmul disappears.  Only one (Lin, DIM) tile is live.
        vh = value_bf[:, h * HEAD_DIM:(h + 1) * HEAD_DIM]        # (Lin, 8) bf16
        v_out_h = jnp.dot(vh, w_out_bf[h * HEAD_DIM:(h + 1) * HEAD_DIM, :],
                          preferred_element_type=jnp.float32)    # (Lin, DIM)
        contrib = jnp.dot(acc.astype(jnp.bfloat16), v_out_h.astype(jnp.bfloat16),
                          preferred_element_type=jnp.float32)    # (TQ, DIM)
        attn = contrib if attn is None else attn + contrib

    attn = attn + b_out[...]
    # TODO(synk): lane-dense output slab (fold to (N, Lq*DIM)) to replace the 48-lane
    # masked stores if they ever show on the critical path.
    o_ref[0] = q + gamma_ref[...] * attn


# ----------------------------------- wrapper --------------------------------------

def _pick_tq(lq):
    if lq <= 128:
        return lq
    for tq in range(128, 7, -8):
        if lq % tq == 0:
            return tq
    return lq


def injector_forward(query, reference_points, feat, spatial_shapes,
                     level_start_index, params):
    # TODO(synk): multi-level support (level_start_index unused for LEVELS == 1).
    del level_start_index
    (qn_w, qn_b, fn_w, fn_b, w_off, b_off, w_attn, b_attn,
     w_val, b_val, w_out, b_out, gamma) = params

    n, lq, dim = query.shape
    lin = feat.shape[1]
    assert dim == DIM
    rp2 = reference_points.reshape(n, lq, 2 * LEVELS)

    # Column-permuted fused query-side projection: [x-offsets | y-offsets | logits]
    # (all in (head, point) order) so the kernel reads each group as one lane slice.
    w_qproj = jnp.concatenate([w_off[:, 0::2], w_off[:, 1::2], w_attn], axis=-1)
    b_qproj = jnp.concatenate([b_off[:, 0::2], b_off[:, 1::2], b_attn], axis=-1)

    # Block-diagonal group-sum matrix: batches the 6 per-head softmax denominators
    # into one tiny MXU matmul inside the kernel.
    npnt = HEADS * POINTS
    gidx = np.arange(npnt) // POINTS
    gsum = jnp.asarray((gidx[:, None] == gidx[None, :]).astype(np.float32))

    # 1) batch-only prologue: value = LN(feat) @ W_v + b_v  (not redone per q-tile)
    vparams = (fn_w, fn_b, w_val, b_val)
    value = pl.pallas_call(
        value_proj_kernel,
        out_shape=jax.ShapeDtypeStruct((n, lin, D_VALUE), jnp.float32),
        grid=(n,),
        in_specs=[pl.BlockSpec((1, lin, dim), lambda b: (b, 0, 0))]
                 + [pl.BlockSpec(p.shape, lambda b, _nd=p.ndim: (0,) * _nd)
                    for p in vparams],
        out_specs=pl.BlockSpec((1, lin, D_VALUE), lambda b: (b, 0, 0)),
        compiler_params=pltpu.CompilerParams(dimension_semantics=("parallel",)),
    )(feat, *vparams)

    # 2) main kernel, gridded over (batch, q-tile); q-tile innermost so the value
    #    block (constant across q-tiles) is not re-DMA'd per tile.
    tq = _pick_tq(lq)
    n_qt = lq // tq
    kparams = (qn_w, qn_b, w_qproj, b_qproj, w_out, b_out, gsum, gamma)

    def _const_spec(p):
        nd = p.ndim
        return pl.BlockSpec(p.shape, lambda b, t, ss, _nd=nd: (0,) * _nd)

    in_specs = [
        pl.BlockSpec((1, tq, dim), lambda b, t, ss: (b, t, 0)),
        pl.BlockSpec((1, tq, 2), lambda b, t, ss: (b, t, 0)),
        pl.BlockSpec((1, lin, D_VALUE), lambda b, t, ss: (b, 0, 0)),
    ] + [_const_spec(p) for p in kparams]

    grid_spec = pltpu.PrefetchScalarGridSpec(
        num_scalar_prefetch=1,
        grid=(n, n_qt),
        in_specs=in_specs,
        out_specs=pl.BlockSpec((1, tq, dim), lambda b, t, ss: (b, t, 0)),
    )

    # Explicit scoped-VMEM budget with headroom: acc/hit temporaries (~a few TQ*Lin
    # f32 slabs), the (double-buffered) value block, small q/rp/out blocks + params.
    est = 4 * (6 * tq * lin + 4 * lin * D_VALUE + 16 * tq * dim + 64 * 1024)
    vmem_limit = int(min(max(est, 32 * 1024 * 1024), 64 * 1024 * 1024))

    return pl.pallas_call(
        injector_kernel,
        out_shape=jax.ShapeDtypeStruct((n, lq, dim), jnp.float32),
        grid_spec=grid_spec,
        compiler_params=pltpu.CompilerParams(
            dimension_semantics=("parallel", "parallel"),
            vmem_limit_bytes=vmem_limit),
    )(spatial_shapes.astype(jnp.int32), query, rp2, value, *kparams)


# ----------------------------- pure-JAX reference -----------------------------

def _ref_ms_deform(value, spatial_shapes, loc, aw):
    # value: (N, Lin, M, Dh); loc: (N, Lq, M, L, P, 2); aw: (N, Lq, M, L, P)
    n, lin, m, dh = value.shape
    lq, lvl, pts = loc.shape[1], loc.shape[3], loc.shape[4]
    h_i = spatial_shapes[0, 0]
    w_i = spatial_shapes[0, 1]
    h_f = h_i.astype(jnp.float32)
    w_f = w_i.astype(jnp.float32)
    px = loc[..., 0] * w_f - 0.5
    py = loc[..., 1] * h_f - 0.5
    x0 = jnp.floor(px)
    y0 = jnp.floor(py)
    wx1 = px - x0
    wx0 = 1.0 - wx1
    wy1 = py - y0
    wy0 = 1.0 - wy1
    x0i = x0.astype(jnp.int32)
    x1i = x0i + 1
    y0i = y0.astype(jnp.int32)
    y1i = y0i + 1
    v = jnp.transpose(value, (0, 2, 1, 3))                      # (N, M, Lin, Dh)

    def gather(xi, yi):
        valid = (xi >= 0) & (xi < w_i) & (yi >= 0) & (yi < h_i)
        idx = jnp.clip(yi, 0, h_i - 1) * w_i + jnp.clip(xi, 0, w_i - 1)
        idxt = jnp.transpose(idx, (0, 2, 1, 3, 4)).reshape(n, m, lq * lvl * pts)
        idx_full = jnp.broadcast_to(idxt[..., None], (n, m, lq * lvl * pts, dh))
        g = jnp.take_along_axis(v, idx_full, axis=2)
        g = g.reshape(n, m, lq, lvl, pts, dh)
        g = jnp.transpose(g, (0, 2, 1, 3, 4, 5))                # (N, Lq, M, L, P, Dh)
        return g * valid[..., None].astype(jnp.float32)

    out = (gather(x0i, y0i) * (wx0 * wy0)[..., None]
           + gather(x1i, y0i) * (wx1 * wy0)[..., None]
           + gather(x0i, y1i) * (wx0 * wy1)[..., None]
           + gather(x1i, y1i) * (wx1 * wy1)[..., None])
    out = (out * aw[..., None]).sum(axis=(3, 4))                # (N, Lq, M, Dh)
    return out.reshape(n, lq, m * dh)


def injector_reference(query, reference_points, feat, spatial_shapes,
                       level_start_index, params):
    del level_start_index
    (qn_w, qn_b, fn_w, fn_b, w_off, b_off, w_attn, b_attn,
     w_val, b_val, w_out, b_out, gamma) = params

    def ln(x, w, b):
        mu = x.mean(-1, keepdims=True)
        xc = x - mu
        var = (xc * xc).mean(-1, keepdims=True)
        return xc / jnp.sqrt(var + EPS) * w[0] + b[0]

    n, lq, dim = query.shape
    lin = feat.shape[1]
    qn = ln(query, qn_w, qn_b)
    fn = ln(feat, fn_w, fn_b)
    value = (fn @ w_val + b_val[0]).reshape(n, lin, HEADS, HEAD_DIM)
    offs = (qn @ w_off + b_off[0]).reshape(n, lq, HEADS, LEVELS, POINTS, 2)
    logits = (qn @ w_attn + b_attn[0]).reshape(n, lq, HEADS, LEVELS * POINTS)
    aw = jax.nn.softmax(logits, axis=-1).reshape(n, lq, HEADS, LEVELS, POINTS)
    h_f = spatial_shapes[0, 0].astype(jnp.float32)
    w_f = spatial_shapes[0, 1].astype(jnp.float32)
    normalizer = jnp.stack([w_f, h_f])                          # (x, y) order
    loc = reference_points[:, :, None, :, None, :] + offs / normalizer
    sampled = _ref_ms_deform(value, spatial_shapes, loc, aw)
    attn = sampled @ w_out + b_out[0]
    return query + gamma[0] * attn


# ------------------------------ deterministic init ------------------------------

def init_params(key):
    ks = jax.random.split(key, 8)

    def linear(k, fan_in, fan_out):
        kw, kb = jax.random.split(k)
        bound = 1.0 / np.sqrt(fan_in)
        w = jax.random.uniform(kw, (fan_in, fan_out), jnp.float32, -bound, bound)
        b = jax.random.uniform(kb, (1, fan_out), jnp.float32, -bound, bound)
        return w, b

    qn_w = 1.0 + 0.1 * jax.random.normal(ks[0], (1, DIM), jnp.float32)
    qn_b = 0.1 * jax.random.normal(ks[1], (1, DIM), jnp.float32)
    fn_w = 1.0 + 0.1 * jax.random.normal(ks[2], (1, DIM), jnp.float32)
    fn_b = 0.1 * jax.random.normal(ks[3], (1, DIM), jnp.float32)
    w_off, b_off = linear(ks[4], DIM, HEADS * LEVELS * POINTS * 2)
    w_attn, b_attn = linear(ks[5], DIM, HEADS * LEVELS * POINTS)
    w_val, b_val = linear(ks[6], DIM, D_VALUE)
    w_out, b_out = linear(ks[7], D_VALUE, DIM)
    gamma = INIT_VALUES * jnp.ones((1, DIM), jnp.float32)
    return (qn_w, qn_b, fn_w, fn_b, w_off, b_off, w_attn, b_attn,
            w_val, b_val, w_out, b_out, gamma)


if __name__ == "__main__":
    key = jax.random.PRNGKey(0)
    k_q, k_f, k_r, k_p = jax.random.split(key, 4)
    n = 2
    h_sp, w_sp = 16, 16
    lin = h_sp * w_sp
    lq = 64

    query = jax.random.normal(k_q, (n, lq, DIM), jnp.float32)
    feat = jax.random.normal(k_f, (n, lin, DIM), jnp.float32)
    reference_points = jax.random.uniform(k_r, (n, lq, LEVELS, 2), jnp.float32,
                                          minval=0.05, maxval=0.95)
    spatial_shapes = jnp.array([[h_sp, w_sp]], dtype=jnp.int32)
    level_start_index = jnp.array([0], dtype=jnp.int32)
    params = init_params(k_p)

    out = injector_forward(query, reference_points, feat, spatial_shapes,
                           level_start_index, params)
    out = jax.block_until_ready(out)

    ref = injector_reference(query, reference_points, feat, spatial_shapes,
                             level_start_index, params)
    ref = jax.block_until_ready(ref)

    assert out.shape == (n, lq, DIM)
    # Tolerance covers the bf16 MXU operands (projections / gather matmuls); all
    # grid_sample location & bilinear-weight math stays f32 inside the kernel.
    if not np.allclose(np.asarray(out), np.asarray(ref), atol=1.5e-2, rtol=1e-2):
        max_err = float(np.max(np.abs(np.asarray(out) - np.asarray(ref))))
        raise AssertionError(f"Pallas kernel mismatch vs reference, max_abs_err={max_err}")
    print("KERNEL_OK")
</pallas_src>

<mosaic_0001>
module attributes {stable_mosaic.version = 11 : i64} {
  func.func @value_proj_kernel(%arg0: i32, %arg1: memref<1x256x48xf32, #tpu.memory_space<vmem>>, %arg2: memref<1x48xf32, #tpu.memory_space<vmem>>, %arg3: memref<1x48xf32, #tpu.memory_space<vmem>>, %arg4: memref<48x48xf32, #tpu.memory_space<vmem>>, %arg5: memref<1x48xf32, #tpu.memory_space<vmem>>, %arg6: memref<1x256x48xf32, #tpu.memory_space<vmem>>) attributes {dimension_semantics = [#tpu.dimension_semantics<parallel>], iteration_bounds = array<i64: 2>, scalar_prefetch = 0 : i64, scratch_operands = 0 : i64, tpu.core_type = #tpu.core_type<tc>, window_params = [{transform_indices = @transform_0, window_bounds = array<i64: 1, 256, 48>}, {pipeline_mode = #tpu.pipeline_mode<synchronous>, transform_indices = @transform_1, window_bounds = array<i64: 1, 48>}, {pipeline_mode = #tpu.pipeline_mode<synchronous>, transform_indices = @transform_2, window_bounds = array<i64: 1, 48>}, {pipeline_mode = #tpu.pipeline_mode<synchronous>, transform_indices = @transform_3, window_bounds = array<i64: 48, 48>}, {pipeline_mode = #tpu.pipeline_mode<synchronous>, transform_indices = @transform_4, window_bounds = array<i64: 1, 48>}, {transform_indices = @transform_5, window_bounds = array<i64: 1, 256, 48>}]} {
    %c0 = arith.constant 0 : index
    %c0_0 = arith.constant 0 : index
    %c0_1 = arith.constant 0 : index
    %0 = vector.load %arg1[%c0, %c0_0, %c0_1] : memref<1x256x48xf32, #tpu.memory_space<vmem>>, vector<1x256x48xf32>
    %1 = vector.shape_cast %0 : vector<1x256x48xf32> to vector<256x48xf32>
    %c0_2 = arith.constant 0 : index
    %c0_3 = arith.constant 0 : index
    %2 = vector.load %arg2[%c0_2, %c0_3] : memref<1x48xf32, #tpu.memory_space<vmem>>, vector<1x48xf32>
    %c0_4 = arith.constant 0 : index
    %c0_5 = arith.constant 0 : index
    %3 = vector.load %arg3[%c0_4, %c0_5] : memref<1x48xf32, #tpu.memory_space<vmem>>, vector<1x48xf32>
    %cst = arith.constant dense<0.000000e+00> : vector<256xf32>
    %4 = vector.multi_reduction <add>, %1, %cst [1] : vector<256x48xf32> to vector<256xf32>
    %5 = vector.shape_cast %4 : vector<256xf32> to vector<256x1xf32>
    %cst_6 = arith.constant 4.800000e+01 : f32
    %6 = vector.broadcast %cst_6 : f32 to vector<256x1xf32>
    %7 = arith.divf %5, %6 : vector<256x1xf32>
    %8 = vector.broadcast %7 : vector<256x1xf32> to vector<256x48xf32>
    %9 = arith.subf %1, %8 : vector<256x48xf32>
    %10 = arith.mulf %9, %9 : vector<256x48xf32>
    %cst_7 = arith.constant dense<0.000000e+00> : vector<256xf32>
    %11 = vector.multi_reduction <add>, %10, %cst_7 [1] : vector<256x48xf32> to vector<256xf32>
    %12 = vector.shape_cast %11 : vector<256xf32> to vector<256x1xf32>
    %cst_8 = arith.constant 4.800000e+01 : f32
    %13 = vector.broadcast %cst_8 : f32 to vector<256x1xf32>
    %14 = arith.divf %12, %13 : vector<256x1xf32>
    %cst_9 = arith.constant 9.99999997E-7 : f32
    %15 = vector.broadcast %cst_9 : f32 to vector<256x1xf32>
    %16 = arith.addf %14, %15 : vector<256x1xf32>
    %17 = math.rsqrt %16 : vector<256x1xf32>
    %18 = vector.broadcast %17 : vector<256x1xf32> to vector<256x48xf32>
    %19 = arith.mulf %9, %18 : vector<256x48xf32>
    %20 = vector.broadcast %2 : vector<1x48xf32> to vector<256x48xf32>
    %21 = arith.mulf %19, %20 : vector<256x48xf32>
    %22 = vector.broadcast %3 : vector<1x48xf32> to vector<256x48xf32>
    %23 = arith.addf %21, %22 : vector<256x48xf32>
    %c0_10 = arith.constant 0 : index
    %c0_11 = arith.constant 0 : index
    %24 = vector.load %arg4[%c0_10, %c0_11] : memref<48x48xf32, #tpu.memory_space<vmem>>, vector<48x48xf32>
    %cst_12 = arith.constant dense<0.000000e+00> : vector<256x48xf32>
    %25 = tpu.matmul %23, %24, %cst_12 {dimension_numbers = #tpu.dot_dimension_numbers<[1], [0], [0], [1], [0, 0, 1, 1], [], []>} : vector<256x48xf32>, vector<48x48xf32>, vector<256x48xf32> -> vector<256x48xf32>
    %c0_13 = arith.constant 0 : index
    %c0_14 = arith.constant 0 : index
    %26 = vector.load %arg5[%c0_13, %c0_14] : memref<1x48xf32, #tpu.memory_space<vmem>>, vector<1x48xf32>
    %27 = vector.broadcast %26 : vector<1x48xf32> to vector<256x48xf32>
    %28 = arith.addf %25, %27 : vector<256x48xf32>
    %c0_15 = arith.constant 0 : index
    %c0_16 = arith.constant 0 : index
    %c0_17 = arith.constant 0 : index
    %29 = vector.load %arg6[%c0_15, %c0_16, %c0_17] : memref<1x256x48xf32, #tpu.memory_space<vmem>>, vector<1x256x48xf32>
    %30 = vector.shape_cast %29 : vector<1x256x48xf32> to vector<256x48xf32>
    %31 = vector.shape_cast %28 : vector<256x48xf32> to vector<1x256x48xf32>
    tpu.vector_store %arg6[%c0_15, %c0_16, %c0_17], %31 {strides = array<i32>} : memref<1x256x48xf32, #tpu.memory_space<vmem>>, vector<1x256x48xf32>,
    return
  }
  func.func @transform_0(%arg0: i32) -> (i32, i32, i32) {
    %c0_i32 = arith.constant 0 : i32
    %c0_i32_0 = arith.constant 0 : i32
    %c0_i32_1 = arith.constant 0 : i32
    return %arg0, %c0_i32, %c0_i32_0 : i32, i32, i32
  }
  func.func @transform_1(%arg0: i32) -> (i32, i32) {
    %c0_i32 = arith.constant 0 : i32
    %c0_i32_0 = arith.constant 0 : i32
    %c0_i32_1 = arith.constant 0 : i32
    return %c0_i32, %c0_i32_0 : i32, i32
  }
  func.func @transform_2(%arg0: i32) -> (i32, i32) {
    %c0_i32 = arith.constant 0 : i32
    %c0_i32_0 = arith.constant 0 : i32
    %c0_i32_1 = arith.constant 0 : i32
    return %c0_i32, %c0_i32_0 : i32, i32
  }
  func.func @transform_3(%arg0: i32) -> (i32, i32) {
    %c0_i32 = arith.constant 0 : i32
    %c0_i32_0 = arith.constant 0 : i32
    %c0_i32_1 = arith.constant 0 : i32
    return %c0_i32, %c0_i32_0 : i32, i32
  }
  func.func @transform_4(%arg0: i32) -> (i32, i32) {
    %c0_i32 = arith.constant 0 : i32
    %c0_i32_0 = arith.constant 0 : i32
    %c0_i32_1 = arith.constant 0 : i32
    return %c0_i32, %c0_i32_0 : i32, i32
  }
  func.func @transform_5(%arg0: i32) -> (i32, i32, i32) {
    %c0_i32 = arith.constant 0 : i32
    %c0_i32_0 = arith.constant 0 : i32
    %c0_i32_1 = arith.constant 0 : i32
    return %arg0, %c0_i32, %c0_i32_0 : i32, i32, i32
  }
}

</mosaic_0001>

<bundles_post_ra>
// kernel: tpu_custom_call.1
= control target key start
LH: loop header
LB: loop body
LE: loop exit
PB: predicated region body
PF: predicated region fallthrough
CT: control target
= control target key end

     0   :  { %s1448_s18 = smov 0   ;;  %s2085_s0 = inlined_call_operand.vmem [shape: f32[2,256,48], index: 0, kind: input, shape index: {}]   ;;  %s2086_s1 = inlined_call_operand.vmem [shape: f32[1,48], index: 1, kind: input, shape index: {}]   ;;  %s2087_s2 = inlined_call_operand.vmem [shape: f32[1,48], index: 2, kind: input, shape index: {}]   ;;  %s2088_s3 = inlined_call_operand.vmem [shape: f32[48,48], index: 3, kind: input, shape index: {}]   ;;  %s2089_s4 = inlined_call_operand.vmem [shape: f32[1,48], index: 4, kind: input, shape index: {}]   ;;  %s2090_s5 = inlined_call_operand.vmem [shape: f32[2,256,48], index: 5, kind: output, shape index: {}]  }
   0x1 LB: > { %s1174_s19 = sadd.s32 4294967295, %s1416_s18   ;;  %p1178_p0 = scmp.ge.s32.totalorder %s1416_s18, 1  ;;  %s1416_s18 = sphi %s1448_s18, %s15_s18  }
   0x2   : > { %p187_p1 = scmp.lt.s32.totalorder %s1416_s18, 3 }
   0x4   : > { %p188_p2 = pnand %p1178_p0, %p187_p1 }
   0x5   : > { %p215_p3 = scmp.lt.s32.totalorder (!%p188_p2), %s1174_s19, 1  ;;  %vm259_vm0 = vcmask (!%p188_p2), 392192  }
   0x6   : > { %191 = sbr.rel (%p188_p2) target bundleno = 610 (0x262), region = 40 }
   0xd   : > { %s2092_s19 = smov (!%p215_p3, %s1174_s19), 1 }
   0xe   : > { %s1220_s20 = sshll.u32 %s2092_s19, 8 }
   0xf   : > { %s1464_s23 = scalar_lea.vmem %s2085_s0, %s1220_s20  ;;  %s1984_s22 = scalar_lea.vmem %s2090_s5, %s1220_s20 }
  0x10   : > { %v1467_v0 = vld [vmem:[%s1464_s23] sm:$0xff]  ;;  %v1470_v1 = vld [vmem:[%s1464_s23 + $0x8] sm:$0xff]  ;;  %v1487_v8 = vld [vmem:[%s1464_s23 + $0x10] sm:$0xff] }
  0x11   : > { %v1473_v2 = vld [vmem:[%s1464_s23 + $0x80] sm:$0xff]  ;;  %v260_v3 = vsel %vm259_vm0, %v1467_v0, 0.0  ;;  %v263_v4 = vsel %vm259_vm0, %v1470_v1, 0.0  ;;  %v1480_v5 = vld [vmem:[%s1464_s23 + $0x88] sm:$0xff]  ;;  %v1490_v9 = vld [vmem:[%s1464_s23 + $0x90] sm:$0xff]  ;;  %v266_v10 = vsel %vm259_vm0, %v1487_v8, 0.0 }
  0x12   : > { %261 = vadd.xlane.f32.xlu0 %v260_v3  ;;  %264 = vadd.xlane.f32.xlu1 %v263_v4  ;;  %v308_v6 = vsel %vm259_vm0, %v1473_v2, 0.0  ;;  %v311_v7 = vsel %vm259_vm0, %v1480_v5, 0.0  ;;  %v314_v11 = vsel %vm259_vm0, %v1490_v9, 0.0  ;;  %v1497_v12 = vld [vmem:[%s1464_s23 + $0x18] sm:$0xff]  ;;  %v1507_v16 = vld [vmem:[%s1464_s23 + $0x20] sm:$0xff]  ;;  %v1517_v20 = vld [vmem:[%s1464_s23 + $0x28] sm:$0xff] }
  0x13   : > { %v1500_v13 = vld [vmem:[%s1464_s23 + $0x98] sm:$0xff]  ;;  %v269_v14 = vsel %vm259_vm0, %v1497_v12, 0.0  ;;  %v1510_v17 = vld [vmem:[%s1464_s23 + $0xa0] sm:$0xff]  ;;  %v272_v18 = vsel %vm259_vm0, %v1507_v16, 0.0  ;;  %v1520_v21 = vld [vmem:[%s1464_s23 + $0xa8] sm:$0xff]  ;;  %v275_v22 = vsel %vm259_vm0, %v1517_v20, 0.0 }
  0x14   : > { %v317_v15 = vsel %vm259_vm0, %v1500_v13, 0.0  ;;  %v320_v19 = vsel %vm259_vm0, %v1510_v17, 0.0  ;;  %v323_v23 = vsel %vm259_vm0, %v1520_v21, 0.0  ;;  %v1527_v24 = vld [vmem:[%s1464_s23 + $0x30] sm:$0xff]  ;;  %v1537_v28 = vld [vmem:[%s1464_s23 + $0x38] sm:$0xff]  ;;  %v1547_v32 = vld [vmem:[%s1464_s23 + $0x40] sm:$0xff] }
  0x15   : > { %v1530_v25 = vld [vmem:[%s1464_s23 + $0xb0] sm:$0xff]  ;;  %v278_v26 = vsel %vm259_vm0, %v1527_v24, 0.0  ;;  %v1540_v29 = vld [vmem:[%s1464_s23 + $0xb8] sm:$0xff]  ;;  %v281_v30 = vsel %vm259_vm0, %v1537_v28, 0.0  ;;  %v1550_v33 = vld [vmem:[%s1464_s23 + $0xc0] sm:$0xff]  ;;  %v284_v34 = vsel %vm259_vm0, %v1547_v32, 0.0 }
  0x16   : > { %309 = vadd.xlane.f32.xlu0 %v308_v6  ;;  %312 = vadd.xlane.f32.xlu1 %v311_v7  ;;  %v326_v27 = vsel %vm259_vm0, %v1530_v25, 0.0  ;;  %v329_v31 = vsel %vm259_vm0, %v1540_v29, 0.0  ;;  %v332_v35 = vsel %vm259_vm0, %v1550_v33, 0.0  ;;  %v1557_v36 = vld [vmem:[%s1464_s23 + $0x48] sm:$0xff]  ;;  %v1567_v40 = vld [vmem:[%s1464_s23 + $0x50] sm:$0xff]  ;;  %v1577_v44 = vld [vmem:[%s1464_s23 + $0x58] sm:$0xff] }
  0x17   : > { %v1560_v37 = vld [vmem:[%s1464_s23 + $0xc8] sm:$0xff]  ;;  %v287_v38 = vsel %vm259_vm0, %v1557_v36, 0.0  ;;  %v1570_v41 = vld [vmem:[%s1464_s23 + $0xd0] sm:$0xff]  ;;  %v290_v42 = vsel %vm259_vm0, %v1567_v40, 0.0  ;;  %v1580_v45 = vld [vmem:[%s1464_s23 + $0xd8] sm:$0xff]  ;;  %v293_v46 = vsel %vm259_vm0, %v1577_v44, 0.0 }
  0x18   : > { %v335_v39 = vsel %vm259_vm0, %v1560_v37, 0.0  ;;  %v338_v43 = vsel %vm259_vm0, %v1570_v41, 0.0  ;;  %v341_v47 = vsel %vm259_vm0, %v1580_v45, 0.0  ;;  %v1587_v48 = vld [vmem:[%s1464_s23 + $0x60] sm:$0xff]  ;;  %v1597_v52 = vld [vmem:[%s1464_s23 + $0x68] sm:$0xff]  ;;  %v1607_v56 = vld [vmem:[%s1464_s23 + $0x70] sm:$0xff] }
  0x19   : > { %v1590_v49 = vld [vmem:[%s1464_s23 + $0xe0] sm:$0xff]  ;;  %v296_v50 = vsel %vm259_vm0, %v1587_v48, 0.0  ;;  %v1600_v53 = vld [vmem:[%s1464_s23 + $0xe8] sm:$0xff]  ;;  %v299_v54 = vsel %vm259_vm0, %v1597_v52, 0.0  ;;  %v1610_v57 = vld [vmem:[%s1464_s23 + $0xf0] sm:$0xff]  ;;  %v302_v58 = vsel %vm259_vm0, %v1607_v56, 0.0 }
  0x1a   : > { %267 = vadd.xlane.f32.xlu0 %v266_v10  ;;  %315 = vadd.xlane.f32.xlu1 %v314_v11  ;;  %v344_v51 = vsel %vm259_vm0, %v1590_v49, 0.0  ;;  %v347_v55 = vsel %vm259_vm0, %v1600_v53, 0.0  ;;  %v350_v59 = vsel %vm259_vm0, %v1610_v57, 0.0  ;;  %v1617_v60 = vld [vmem:[%s1464_s23 + $0x78] sm:$0xff] }
  0x1b   : > { %v1620_v61 = vld [vmem:[%s1464_s23 + $0xf8] sm:$0xff]  ;;  %v305_v62 = vsel %vm259_vm0, %v1617_v60, 0.0 }
  0x1c   : > { %v353_v63 = vsel %vm259_vm0, %v1620_v61, 0.0 }
  0x1e   : > { %270 = vadd.xlane.f32.xlu0 %v269_v14  ;;  %318 = vadd.xlane.f32.xlu1 %v317_v15 }
  0x22   : > { %273 = vadd.xlane.f32.xlu0 %v272_v18  ;;  %321 = vadd.xlane.f32.xlu1 %v320_v19 }
  0x26   : > { %276 = vadd.xlane.f32.xlu0 %v275_v22  ;;  %324 = vadd.xlane.f32.xlu1 %v323_v23 }
  0x2a   : > { %279 = vadd.xlane.f32.xlu0 %v278_v26  ;;  %327 = vadd.xlane.f32.xlu1 %v326_v27 }
  0x2e   : > { %282 = vadd.xlane.f32.xlu0 %v281_v30  ;;  %330 = vadd.xlane.f32.xlu1 %v329_v31 }
  0x32   : > { %285 = vadd.xlane.f32.xlu0 %v284_v34  ;;  %333 = vadd.xlane.f32.xlu1 %v332_v35 }
  0x36   : > { %288 = vadd.xlane.f32.xlu0 %v287_v38  ;;  %336 = vadd.xlane.f32.xlu1 %v335_v39 }
  0x3a   : > { %291 = vadd.xlane.f32.xlu0 %v290_v42  ;;  %339 = vadd.xlane.f32.xlu1 %v338_v43 }
  0x3e   : > { %294 = vadd.xlane.f32.xlu0 %v293_v46  ;;  %342 = vadd.xlane.f32.xlu1 %v341_v47 }
  0x42   : > { %297 = vadd.xlane.f32.xlu0 %v296_v50  ;;  %345 = vadd.xlane.f32.xlu1 %v344_v51 }
  0x46   : > { %300 = vadd.xlane.f32.xlu0 %v299_v54  ;;  %348 = vadd.xlane.f32.xlu1 %v347_v55 }
  0x4a   : > { %303 = vadd.xlane.f32.xlu0 %v302_v58  ;;  %351 = vadd.xlane.f32.xlu1 %v350_v59 }
  0x4e   : > { %306 = vadd.xlane.f32.xlu0 %v305_v62  ;;  %354 = vadd.xlane.f32.xlu1 %v353_v63 }
  0x9f   : > { %v262_v3 = vpop.xlane.xlu0 %261  ;;  %v265_v4 = vpop.xlane.xlu1 %264 }
  0xa0   : > { %v357_v6 = vmul.f32 0.020833334, %v262_v3  ;;  %v358_v7 = vmul.f32 0.020833334, %v265_v4 }
  0xa2   : > { %v1627_v10 = vsub.f32 %v1467_v0, %v357_v6  ;;  %v1630_v11 = vsub.f32 %v1470_v1, %v358_v7 }
  0xa3   : > { %v310_v14 = vpop.xlane.xlu0 %309  ;;  %v313_v15 = vpop.xlane.xlu1 %312 }
  0xa4   : > { %v373_v18 = vmul.f32 0.020833334, %v310_v14  ;;  %v374_v19 = vmul.f32 0.020833334, %v313_v15  ;;  %v421_v22 = vmul.f32 %v1627_v10, %v1627_v10  ;;  %v422_v23 = vmul.f32 %v1630_v11, %v1630_v11 }
  0xa6   : > { %v1637_v26 = vsub.f32 %v1473_v2, %v373_v18  ;;  %v1640_v27 = vsub.f32 %v1480_v5, %v374_v19  ;;  %v453_v0 = vsel %vm259_vm0, %v421_v22, 0.0  ;;  %v456_v31 = vsel %vm259_vm0, %v422_v23, 0.0 }
  0xa7   : > { %454 = vadd.xlane.f32.xlu0 %v453_v0  ;;  %v268_v1 = vpop.xlane.xlu0 %267  ;;  %v316_v30 = vpop.xlane.xlu1 %315 }
  0xa8   : > { %v359_v34 = vmul.f32 0.020833334, %v268_v1  ;;  %v375_v35 = vmul.f32 0.020833334, %v316_v30  ;;  %v437_v38 = vmul.f32 %v1637_v26, %v1637_v26  ;;  %v438_v39 = vmul.f32 %v1640_v27, %v1640_v27 }
  0xaa   : > { %v1649_v2 = vsub.f32 %v1487_v8, %v359_v34  ;;  %v1652_v5 = vsub.f32 %v1490_v9, %v375_v35  ;;  %v501_v42 = vsel %vm259_vm0, %v437_v38, 0.0  ;;  %v504_v47 = vsel %vm259_vm0, %v438_v39, 0.0 }
  0xab   : > { %457 = vadd.xlane.f32.xlu0 %v456_v31  ;;  %502 = vadd.xlane.f32.xlu1 %v501_v42  ;;  %v271_v43 = vpop.xlane.xlu0 %270  ;;  %v319_v46 = vpop.xlane.xlu1 %318 }
  0xac   : > { %v360_v50 = vmul.f32 0.020833334, %v271_v43  ;;  %v376_v51 = vmul.f32 0.020833334, %v319_v46  ;;  %v423_v54 = vmul.f32 %v1649_v2, %v1649_v2  ;;  %v439_v8 = vmul.f32 %v1652_v5, %v1652_v5 }
  0xae   : > { %v1661_v55 = vsub.f32 %v1497_v12, %v360_v50  ;;  %v1664_v9 = vsub.f32 %v1500_v13, %v376_v51  ;;  %v459_v58 = vsel %vm259_vm0, %v423_v54, 0.0  ;;  %v507_v63 = vsel %vm259_vm0, %v439_v8, 0.0 }
  0xaf   : > { %505 = vadd.xlane.f32.xlu1 %v504_v47  ;;  %460 = vadd.xlane.f32.xlu0 %v459_v58  ;;  %v274_v59 = vpop.xlane.xlu0 %273  ;;  %v322_v62 = vpop.xlane.xlu1 %321 }
  0xb0   : > { %v361_v3 = vmul.f32 0.020833334, %v274_v59  ;;  %v377_v4 = vmul.f32 0.020833334, %v322_v62  ;;  %v424_v6 = vmul.f32 %v1661_v55, %v1661_v55  ;;  %v440_v12 = vmul.f32 %v1664_v9, %v1664_v9 }
  0xb2   : > { %v1673_v7 = vsub.f32 %v1507_v16, %v361_v3  ;;  %v1676_v13 = vsub.f32 %v1510_v17, %v377_v4  ;;  %v462_v14 = vsel %vm259_vm0, %v424_v6, 0.0  ;;  %v510_v19 = vsel %vm259_vm0, %v440_v12, 0.0 }
  0xb3   : > { %508 = vadd.xlane.f32.xlu1 %v507_v63  ;;  %463 = vadd.xlane.f32.xlu0 %v462_v14  ;;  %v277_v15 = vpop.xlane.xlu0 %276  ;;  %v325_v18 = vpop.xlane.xlu1 %324 }
  0xb4   : > { %v362_v22 = vmul.f32 0.020833334, %v277_v15  ;;  %v378_v23 = vmul.f32 0.020833334, %v325_v18  ;;  %v425_v0 = vmul.f32 %v1673_v7, %v1673_v7  ;;  %v441_v16 = vmul.f32 %v1676_v13, %v1676_v13  ;;  %v754_v15 = vld [vmem:[%s2088_s3 + $0x8] sm:$0xff] }
  0xb6   : > { %v1685_v1 = vsub.f32 %v1517_v20, %v362_v22  ;;  %v1688_v17 = vsub.f32 %v1520_v21, %v378_v23  ;;  %v465_v30 = vsel %vm259_vm0, %v425_v0, 0.0  ;;  %v513_v35 = vsel %vm259_vm0, %v441_v16, 0.0 }
  0xb7   : > { %511 = vadd.xlane.f32.xlu1 %v510_v19  ;;  %466 = vadd.xlane.f32.xlu0 %v465_v30  ;;  %v280_v31 = vpop.xlane.xlu0 %279  ;;  %v328_v34 = vpop.xlane.xlu1 %327 }
  0xb8   : > { %v363_v38 = vmul.f32 0.020833334, %v280_v31  ;;  %v379_v39 = vmul.f32 0.020833334, %v328_v34  ;;  %v426_v42 = vmul.f32 %v1685_v1, %v1685_v1  ;;  %v442_v20 = vmul.f32 %v1688_v17, %v1688_v17 }
  0xba   : > { %v1697_v43 = vsub.f32 %v1527_v24, %v363_v38  ;;  %v1700_v21 = vsub.f32 %v1530_v25, %v379_v39  ;;  %v468_v46 = vsel %vm259_vm0, %v426_v42, 0.0  ;;  %v516_v51 = vsel %vm259_vm0, %v442_v20, 0.0  ;;  %v756_v38 = vld [vmem:[%s2088_s3 + $0x18] sm:$0xff] }
  0xbb   : > { %514 = vadd.xlane.f32.xlu1 %v513_v35  ;;  %469 = vadd.xlane.f32.xlu0 %v468_v46  ;;  %v283_v47 = vpop.xlane.xlu0 %282  ;;  %v331_v50 = vpop.xlane.xlu1 %330 }
  0xbc   : > { %v364_v54 = vmul.f32 0.020833334, %v283_v47  ;;  %v380_v8 = vmul.f32 0.020833334, %v331_v50  ;;  %v427_v58 = vmul.f32 %v1697_v43, %v1697_v43  ;;  %v443_v24 = vmul.f32 %v1700_v21, %v1700_v21 }
  0xbe   : > { %v1709_v59 = vsub.f32 %v1537_v28, %v364_v54  ;;  %v1712_v25 = vsub.f32 %v1540_v29, %v380_v8  ;;  %v471_v62 = vsel %vm259_vm0, %v427_v58, 0.0  ;;  %v519_v4 = vsel %vm259_vm0, %v443_v24, 0.0  ;;  %v753_v29 = vld [vmem:[%s2088_s3] sm:$0xff]  ;;  %v758_v24 = vld [vmem:[%s2088_s3 + $0x28] sm:$0xff] }
  0xbf   : > { %517 = vadd.xlane.f32.xlu1 %v516_v51  ;;  %472 = vadd.xlane.f32.xlu0 %v471_v62  ;;  %v286_v63 = vpop.xlane.xlu0 %285  ;;  %v334_v3 = vpop.xlane.xlu1 %333  ;;  %v1320_v18 = vpack.c.bf16 %v754_v15, %v753_v29 }
  0xc0   : > { %v365_v6 = vmul.f32 0.020833334, %v286_v63  ;;  %v381_v12 = vmul.f32 0.020833334, %v334_v3  ;;  %v428_v14 = vmul.f32 %v1709_v59, %v1709_v59  ;;  %v444_v28 = vmul.f32 %v1712_v25, %v1712_v25 }
  0xc1   : > { %1321 = vmatprep.subr.bf16.mxu0 %v1320_v18  ;;  %1332 = vmatprep.subr.bf16.mxu1 %v1320_v18 }
  0xc2   : > { %v1727_v19 = vsub.f32 %v1547_v32, %v365_v6  ;;  %v1730_v22 = vsub.f32 %v1550_v33, %v381_v12  ;;  %v474_v23 = vsel %vm259_vm0, %v428_v14, 0.0  ;;  %v522_v30 = vsel %vm259_vm0, %v444_v28, 0.0  ;;  %v755_v33 = vld [vmem:[%s2088_s3 + $0x10] sm:$0xff]  ;;  %1323 = vmatpush3.bf16.msra.mxu0 %v1320_v18  ;;  %1335 = vmatpush3.bf16.msra.mxu1 %v1320_v18 }
  0xc3   : > { %520 = vadd.xlane.f32.xlu1 %v519_v4  ;;  %475 = vadd.xlane.f32.xlu0 %v474_v23  ;;  %v289_v0 = vpop.xlane.xlu0 %288  ;;  %v337_v16 = vpop.xlane.xlu1 %336  ;;  %v1324_v39 = vpack.c.bf16 %v756_v38, %v755_v33 }
  0xc4   : > { %v366_v31 = vmul.f32 0.020833334, %v289_v0  ;;  %v382_v34 = vmul.f32 0.020833334, %v337_v16  ;;  %v429_v35 = vmul.f32 %v1727_v19, %v1727_v19  ;;  %v445_v32 = vmul.f32 %v1730_v22, %v1730_v22 }
  0xc5   : > { %1325 = vmatprep.subr.bf16.mxu0 %v1324_v39  ;;  %1333 = vmatprep.subr.bf16.mxu1 %v1324_v39 }
  0xc6   : > { %v1745_v42 = vsub.f32 %v1557_v36, %v366_v31  ;;  %v1748_v20 = vsub.f32 %v1560_v37, %v382_v34  ;;  %v477_v46 = vsel %vm259_vm0, %v429_v35, 0.0  ;;  %v525_v51 = vsel %vm259_vm0, %v445_v32, 0.0  ;;  %v757_v37 = vld [vmem:[%s2088_s3 + $0x20] sm:$0xff]  ;;  %1327 = vmatpush3.bf16.msra.mxu0 %v1324_v39  ;;  %1336 = vmatpush3.bf16.msra.mxu1 %v1324_v39 }
  0xc7   : > { %523 = vadd.xlane.f32.xlu1 %v522_v30  ;;  %478 = vadd.xlane.f32.xlu0 %v477_v46  ;;  %v292_v47 = vpop.xlane.xlu0 %291  ;;  %v340_v50 = vpop.xlane.xlu1 %339  ;;  %v1328_v62 = vpack.c.bf16 %v758_v24, %v757_v37 }
  0xc8   : > { %v367_v54 = vmul.f32 0.020833334, %v292_v47  ;;  %v383_v8 = vmul.f32 0.020833334, %v340_v50  ;;  %v430_v58 = vmul.f32 %v1745_v42, %v1745_v42  ;;  %v446_v36 = vmul.f32 %v1748_v20, %v1748_v20 }
  0xc9   : > { %1329 = vmatprep.subr.bf16.mxu0 %v1328_v62  ;;  %1334 = vmatprep.subr.bf16.mxu1 %v1328_v62 }
  0xca   : > { %v1763_v63 = vsub.f32 %v1567_v40, %v367_v54  ;;  %v1766_v3 = vsub.f32 %v1570_v41, %v383_v8  ;;  %v480_v4 = vsel %vm259_vm0, %v430_v58, 0.0  ;;  %v528_v14 = vsel %vm259_vm0, %v446_v36, 0.0  ;;  %1331 = vmatpush3.bf16.msra.mxu0 %v1328_v62  ;;  %1337 = vmatpush3.bf16.msra.mxu1 %v1328_v62 }
  0xcb   : > { %526 = vadd.xlane.f32.xlu1 %v525_v51  ;;  %481 = vadd.xlane.f32.xlu0 %v480_v4  ;;  %v295_v6 = vpop.xlane.xlu0 %294  ;;  %v343_v12 = vpop.xlane.xlu1 %342 }
  0xcc   : > { %v368_v28 = vmul.f32 0.020833334, %v295_v6  ;;  %v384_v29 = vmul.f32 0.020833334, %v343_v12  ;;  %v431_v15 = vmul.f32 %v1763_v63, %v1763_v63  ;;  %v447_v40 = vmul.f32 %v1766_v3, %v1766_v3 }
  0xce   : > { %v1775_v41 = vsub.f32 %v1577_v44, %v368_v28  ;;  %v1778_v18 = vsub.f32 %v1580_v45, %v384_v29  ;;  %v483_v23 = vsel %vm259_vm0, %v431_v15, 0.0  ;;  %v531_v30 = vsel %vm259_vm0, %v447_v40, 0.0 }
  0xcf   : > { %529 = vadd.xlane.f32.xlu1 %v528_v14  ;;  %484 = vadd.xlane.f32.xlu0 %v483_v23  ;;  %v298_v0 = vpop.xlane.xlu0 %297  ;;  %v346_v16 = vpop.xlane.xlu1 %345 }
  0xd0   : > { %v369_v31 = vmul.f32 0.020833334, %v298_v0  ;;  %v385_v34 = vmul.f32 0.020833334, %v346_v16  ;;  %v432_v35 = vmul.f32 %v1775_v41, %v1775_v41  ;;  %v448_v44 = vmul.f32 %v1778_v18, %v1778_v18 }
  0xd2   : > { %v1787_v32 = vsub.f32 %v1587_v48, %v369_v31  ;;  %v1790_v45 = vsub.f32 %v1590_v49, %v385_v34  ;;  %v486_v33 = vsel %vm259_vm0, %v432_v35, 0.0  ;;  %v534_v46 = vsel %vm259_vm0, %v448_v44, 0.0 }
  0xd3   : > { %532 = vadd.xlane.f32.xlu1 %v531_v30  ;;  %487 = vadd.xlane.f32.xlu0 %v486_v33  ;;  %v301_v38 = vpop.xlane.xlu0 %300  ;;  %v349_v39 = vpop.xlane.xlu1 %348 }
  0xd4   : > { %v370_v47 = vmul.f32 0.020833334, %v301_v38  ;;  %v386_v50 = vmul.f32 0.020833334, %v349_v39  ;;  %v433_v51 = vmul.f32 %v1787_v32, %v1787_v32  ;;  %v449_v48 = vmul.f32 %v1790_v45, %v1790_v45 }
  0xd6   : > { %v1799_v54 = vsub.f32 %v1597_v52, %v370_v47  ;;  %v1802_v49 = vsub.f32 %v1600_v53, %v386_v50  ;;  %v489_v8 = vsel %vm259_vm0, %v433_v51, 0.0  ;;  %v537_v37 = vsel %vm259_vm0, %v449_v48, 0.0 }
  0xd7   : > { %535 = vadd.xlane.f32.xlu1 %v534_v46  ;;  %490 = vadd.xlane.f32.xlu0 %v489_v8  ;;  %v304_v58 = vpop.xlane.xlu0 %303  ;;  %v352_v36 = vpop.xlane.xlu1 %351 }
  0xd8   : > { %v371_v24 = vmul.f32 0.020833334, %v304_v58  ;;  %v387_v62 = vmul.f32 0.020833334, %v352_v36  ;;  %v434_v4 = vmul.f32 %v1799_v54, %v1799_v54  ;;  %v450_v52 = vmul.f32 %v1802_v49, %v1802_v49 }
  0xda   : > { %v1811_v6 = vsub.f32 %v1607_v56, %v371_v24  ;;  %v1814_v53 = vsub.f32 %v1610_v57, %v387_v62  ;;  %v492_v12 = vsel %vm259_vm0, %v434_v4, 0.0  ;;  %v540_v29 = vsel %vm259_vm0, %v450_v52, 0.0 }
  0xdb   : > { %538 = vadd.xlane.f32.xlu1 %v537_v37  ;;  %493 = vadd.xlane.f32.xlu0 %v492_v12  ;;  %v307_v14 = vpop.xlane.xlu0 %306  ;;  %v355_v28 = vpop.xlane.xlu1 %354 }
  0xdc   : > { %v372_v15 = vmul.f32 0.020833334, %v307_v14  ;;  %v388_v40 = vmul.f32 0.020833334, %v355_v28  ;;  %v435_v23 = vmul.f32 %v1811_v6, %v1811_v6  ;;  %v451_v56 = vmul.f32 %v1814_v53, %v1814_v53 }
  0xde   : > { %v1823_v0 = vsub.f32 %v1617_v60, %v372_v15  ;;  %v1826_v57 = vsub.f32 %v1620_v61, %v388_v40  ;;  %v495_v16 = vsel %vm259_vm0, %v435_v23, 0.0  ;;  %v543_v30 = vsel %vm259_vm0, %v451_v56, 0.0  ;;  %v1839_v15 = vld [vmem:[%s2086_s1] ss:$0 sm:$0xff] }
  0xdf   : > { %541 = vadd.xlane.f32.xlu1 %v540_v29  ;;  %496 = vadd.xlane.f32.xlu0 %v495_v16 }
  0xe0   : > { %v436_v31 = vmul.f32 %v1823_v0, %v1823_v0  ;;  %v452_v34 = vmul.f32 %v1826_v57, %v1826_v57 }
  0xe2   : > { %v498_v35 = vsel %vm259_vm0, %v436_v31, 0.0  ;;  %v546_v60 = vsel %vm259_vm0, %v452_v34, 0.0  ;;  %v1845_v31 = vld [vmem:[%s2087_s2] ss:$0 sm:$0xff] }
  0xe3   : > { %544 = vadd.xlane.f32.xlu1 %v543_v30  ;;  %499 = vadd.xlane.f32.xlu0 %v498_v35 }
  0xe7   : > { %547 = vadd.xlane.f32.xlu1 %v546_v60 }
 0x134   : > { %v455_v61 = vpop.xlane.xlu0 %454 }
 0x135   : > { %v549_v44 = vmul.f32 0.020833334, %v455_v61 }
 0x137   : > { %v581_v33 = vadd.f32 1e-06, %v549_v44 }
 0x138   : > { %v503_v38 = vpop.xlane.xlu1 %502  ;;  %v458_v39 = vpop.xlane.xlu0 %457 }
 0x139   : > { %1346 = vrsqrt.f32 %v581_v33  ;;  %v565_v46 = vmul.f32 0.020833334, %v503_v38  ;;  %v550_v47 = vmul.f32 0.020833334, %v458_v39 }
 0x13b   : > { %v597_v50 = vadd.f32 1e-06, %v565_v46  ;;  %v582_v51 = vadd.f32 1e-06, %v550_v47 }
 0x13c   : > { %v506_v48 = vpop.xlane.xlu1 %505  ;;  %v461_v8 = vpop.xlane.xlu0 %460 }
 0x13d   : > { %1348 = vrsqrt.f32 %v597_v50  ;;  %v566_v58 = vmul.f32 0.020833334, %v506_v48  ;;  %v551_v36 = vmul.f32 0.020833334, %v461_v8 }
 0x13e   : > { %1350 = vrsqrt.f32 %v582_v51 }
 0x13f   : > { %v598_v37 = vadd.f32 1e-06, %v566_v58  ;;  %v583_v24 = vadd.f32 1e-06, %v551_v36 }
 0x140   : > { %v509_v62 = vpop.xlane.xlu1 %508  ;;  %v464_v4 = vpop.xlane.xlu0 %463 }
 0x141   : > { %1352 = vrsqrt.f32 %v598_v37  ;;  %v567_v52 = vmul.f32 0.020833334, %v509_v62  ;;  %v552_v12 = vmul.f32 0.020833334, %v464_v4 }
 0x142   : > { %1354 = vrsqrt.f32 %v583_v24 }
 0x143   : > { %v1347_v14 = vpop.eup %1346  ;;  %v599_v28 = vadd.f32 1e-06, %v567_v52  ;;  %v584_v29 = vadd.f32 1e-06, %v552_v12 }
 0x144   : > { %v512_v40 = vpop.xlane.xlu1 %511  ;;  %v467_v23 = vpop.xlane.xlu0 %466  ;;  %v645_v56 = vmul.f32 %v1347_v14, %v1627_v10 }
 0x145   : > { %1356 = vrsqrt.f32 %v599_v28  ;;  %v568_v16 = vmul.f32 0.020833334, %v512_v40  ;;  %v553_v30 = vmul.f32 0.020833334, %v467_v23 }
 0x146   : > { %1358 = vrsqrt.f32 %v584_v29  ;;  %v683_v34 = vmul.f32 %v1839_v15, %v645_v56 }
 0x147   : > { %v1349_v35 = vpop.eup %1348  ;;  %v600_v60 = vadd.f32 1e-06, %v568_v16  ;;  %v585_v61 = vadd.f32 1e-06, %v553_v30 }
 0x148   : > { %v1351_v44 = vpop.eup %1350  ;;  %v515_v33 = vpop.xlane.xlu1 %514  ;;  %v721_v39 = vadd.f32 %v1845_v31, %v683_v34  ;;  %v661_v10 = vmul.f32 %v1349_v35, %v1637_v26 }
 0x149   : > { %v470_v38 = vpop.xlane.xlu0 %469  ;;  %1360 = vrsqrt.f32 %v600_v60  ;;  %v569_v46 = vmul.f32 0.020833334, %v515_v33  ;;  %v646_v50 = vmul.f32 %v1351_v44, %v1630_v11 }
 0x14a   : > { %v554_v47 = vmul.f32 0.020833334, %v470_v38  ;;  %1362 = vrsqrt.f32 %v585_v61  ;;  %1272 = vmatprep.mubr.msk.f32.mxu0 %vm259_vm0, %v721_v39  ;;  %v699_v51 = vmul.f32 %v1839_v15, %v661_v10 }
 0x14b   : > { %v1353_v48 = vpop.eup %1352  ;;  %v601_v8 = vadd.f32 1e-06, %v569_v46  ;;  %v684_v36 = vmul.f32 %v1839_v15, %v646_v50 }
 0x14c   : > { %v586_v58 = vadd.f32 1e-06, %v554_v47  ;;  %v1355_v37 = vpop.eup %1354  ;;  %v518_v24 = vpop.xlane.xlu1 %517  ;;  %v737_v26 = vadd.f32 %v1845_v31, %v699_v51  ;;  %v662_v4 = vmul.f32 %v1353_v48, %v1640_v27 }
 0x14d   : > { %v473_v62 = vpop.xlane.xlu0 %472  ;;  %1364 = vrsqrt.f32 %v601_v8  ;;  %v570_v52 = vmul.f32 0.020833334, %v518_v24  ;;  %v722_v12 = vadd.f32 %v1845_v31, %v684_v36  ;;  %v647_v14 = vmul.f32 %v1355_v37, %v1649_v2 }
 0x14e   : > { %v555_v11 = vmul.f32 0.020833334, %v473_v62  ;;  %1366 = vrsqrt.f32 %v586_v58  ;;  %1296 = vmatprep.mubr.msk.f32.mxu1 %vm259_vm0, %v737_v26  ;;  %v700_v28 = vmul.f32 %v1839_v15, %v662_v4 }
 0x14f   : > { %v1357_v29 = vpop.eup %1356  ;;  %v602_v40 = vadd.f32 1e-06, %v570_v52  ;;  %1273 = vmatmul.mubr.msk.f32.vlgmr.msra.gmra.mrb[0].mxu0 %vm259_vm0, %v722_v12  ;;  %v685_v30 = vmul.f32 %v1839_v15, %v647_v14 }
 0x150   : > { %v587_v23 = vadd.f32 1e-06, %v555_v11  ;;  %v1359_v56 = vpop.eup %1358  ;;  %v521_v16 = vpop.xlane.xlu1 %520  ;;  %v738_v34 = vadd.f32 %v1845_v31, %v700_v28  ;;  %v663_v35 = vmul.f32 %v1357_v29, %v1652_v5 }
 0x151   : > { %v476_v27 = vpop.xlane.xlu0 %475  ;;  %1368 = vrsqrt.f32 %v602_v40  ;;  %v571_v60 = vmul.f32 0.020833334, %v521_v16  ;;  %v648_v2 = vmul.f32 %v1359_v56, %v1661_v55  ;;  %v723_v44 = vadd.f32 %v1845_v31, %v685_v30 }
 0x152   : > { %v556_v61 = vmul.f32 0.020833334, %v476_v27  ;;  %1370 = vrsqrt.f32 %v587_v23  ;;  %1297 = vmatmul.mubr.msk.f32.vlgmr.msra.gmra.mrb[0].mxu1 %vm259_vm0, %v738_v34  ;;  %v701_v33 = vmul.f32 %v1839_v15, %v663_v35 }
 0x153   : > { %v1361_v38 = vpop.eup %1360  ;;  %v603_v39 = vadd.f32 1e-06, %v571_v60  ;;  %v686_v46 = vmul.f32 %v1839_v15, %v648_v2  ;;  %1275 = vmatprep.mubr.msk.f32.mxu0 %vm259_vm0, %v723_v44 }
 0x154   : > { %v588_v10 = vadd.f32 1e-06, %v556_v61  ;;  %v1363_v47 = vpop.eup %1362  ;;  %v524_v5 = vpop.xlane.xlu1 %523  ;;  %v739_v51 = vadd.f32 %v1845_v31, %v701_v33  ;;  %v664_v55 = vmul.f32 %v1361_v38, %v1664_v9 }
 0x155   : > { %v479_v50 = vpop.xlane.xlu0 %478  ;;  %1372 = vrsqrt.f32 %v603_v39  ;;  %v572_v48 = vmul.f32 0.020833334, %v524_v5  ;;  %v724_v58 = vadd.f32 %v1845_v31, %v686_v46  ;;  %v649_v36 = vmul.f32 %v1363_v47, %v1673_v7 }
 0x156   : > { %v557_v8 = vmul.f32 0.020833334, %v479_v50  ;;  %1374 = vrsqrt.f32 %v588_v10  ;;  %1299 = vmatprep.mubr.msk.f32.mxu1 %vm259_vm0, %v739_v51  ;;  %v702_v37 = vmul.f32 %v1839_v15, %v664_v55 }
 0x157   : > { %v1365_v24 = vpop.eup %1364  ;;  %v604_v62 = vadd.f32 1e-06, %v572_v48  ;;  %1276 = vmatmul.mubr.msk.f32.gmra.mrb[2].mxu0 %vm259_vm0, %v724_v58  ;;  %v687_v11 = vmul.f32 %v1839_v15, %v649_v36 }
 0x158   : > { %v589_v26 = vadd.f32 1e-06, %v557_v8  ;;  %v1367_v4 = vpop.eup %1366  ;;  %v527_v52 = vpop.xlane.xlu1 %526  ;;  %v740_v12 = vadd.f32 %v1845_v31, %v702_v37  ;;  %v665_v14 = vmul.f32 %v1365_v24, %v1676_v13 }
 0x159   : > { %v482_v9 = vpop.xlane.xlu0 %481  ;;  %1376 = vrsqrt.f32 %v604_v62  ;;  %v573_v28 = vmul.f32 0.020833334, %v527_v52  ;;  %v650_v7 = vmul.f32 %v1367_v4, %v1685_v1  ;;  %v725_v40 = vadd.f32 %v1845_v31, %v687_v11 }
 0x15a   : > { %v558_v29 = vmul.f32 0.020833334, %v482_v9  ;;  %1378 = vrsqrt.f32 %v589_v26  ;;  %1300 = vmatmul.mubr.msk.f32.gmra.mrb[2].mxu1 %vm259_vm0, %v740_v12  ;;  %v703_v23 = vmul.f32 %v1839_v15, %v665_v14 }
 0x15b   : > { %v1369_v56 = vpop.eup %1368  ;;  %v605_v16 = vadd.f32 1e-06, %v573_v28  ;;  %v688_v30 = vmul.f32 %v1839_v15, %v650_v7  ;;  %1278 = vmatprep.mubr.msk.f32.mxu0 %vm259_vm0, %v725_v40 }
 0x15c   : > { %v590_v27 = vadd.f32 1e-06, %v558_v29  ;;  %v1371_v34 = vpop.eup %1370  ;;  %v530_v13 = vpop.xlane.xlu1 %529  ;;  %v741_v60 = vadd.f32 %v1845_v31, %v703_v23  ;;  %v666_v1 = vmul.f32 %v1369_v56, %v1688_v17 }
 0x15d   : > { %v485_v35 = vpop.xlane.xlu0 %484  ;;  %1380 = vrsqrt.f32 %v605_v16  ;;  %v574_v61 = vmul.f32 0.020833334, %v530_v13  ;;  %v726_v44 = vadd.f32 %v1845_v31, %v688_v30  ;;  %v651_v33 = vmul.f32 %v1371_v34, %v1697_v43 }
 0x15e   : > { %v559_v2 = vmul.f32 0.020833334, %v485_v35  ;;  %1382 = vrsqrt.f32 %v590_v27  ;;  %1302 = vmatprep.mubr.msk.f32.mxu1 %vm259_vm0, %v741_v60  ;;  %v704_v38 = vmul.f32 %v1839_v15, %v666_v1 }
 0x15f   : > { %v1373_v39 = vpop.eup %1372  ;;  %v606_v10 = vadd.f32 1e-06, %v574_v61  ;;  %1279 = vmatmul.mubr.msk.f32.gmra.mrb[4].mxu0 %vm259_vm0, %v726_v44  ;;  %v689_v50 = vmul.f32 %v1839_v15, %v651_v33 }
 0x160   : > { %v591_v46 = vadd.f32 1e-06, %v559_v2  ;;  %v1375_v47 = vpop.eup %1374  ;;  %v533_v5 = vpop.xlane.xlu1 %532  ;;  %v742_v51 = vadd.f32 %v1845_v31, %v704_v38  ;;  %v667_v55 = vmul.f32 %v1373_v39, %v1700_v21 }
 0x161   : > { %v488_v17 = vpop.xlane.xlu0 %487  ;;  %1384 = vrsqrt.f32 %v606_v10  ;;  %v575_v48 = vmul.f32 0.020833334, %v533_v5  ;;  %v652_v43 = vmul.f32 %v1375_v47, %v1709_v59  ;;  %v727_v58 = vadd.f32 %v1845_v31, %v689_v50 }
 0x162   : > { %v560_v8 = vmul.f32 0.020833334, %v488_v17  ;;  %1386 = vrsqrt.f32 %v591_v46  ;;  %1303 = vmatmul.mubr.msk.f32.gmra.mrb[4].mxu1 %vm259_vm0, %v742_v51  ;;  %v705_v36 = vmul.f32 %v1839_v15, %v667_v55 }
 0x163   : > { %v1377_v37 = vpop.eup %1376  ;;  %v607_v24 = vadd.f32 1e-06, %v575_v48  ;;  %v690_v26 = vmul.f32 %v1839_v15, %v652_v43  ;;  %1281 = vmatprep.mubr.msk.f32.mxu0 %vm259_vm0, %v727_v58 }
 0x164   : > { %v592_v62 = vadd.f32 1e-06, %v560_v8  ;;  %v1379_v4 = vpop.eup %1378  ;;  %v536_v21 = vpop.xlane.xlu1 %535  ;;  %v743_v9 = vadd.f32 %v1845_v31, %v705_v36  ;;  %v668_v59 = vmul.f32 %v1377_v37, %v1712_v25 }
 0x165   : > { %v491_v52 = vpop.xlane.xlu0 %490  ;;  %1388 = vrsqrt.f32 %v607_v24  ;;  %v576_v11 = vmul.f32 0.020833334, %v536_v21  ;;  %v728_v14 = vadd.f32 %v1845_v31, %v690_v26  ;;  %v653_v28 = vmul.f32 %v1379_v4, %v1727_v19 }
 0x166   : > { %v561_v12 = vmul.f32 0.020833334, %v491_v52  ;;  %1390 = vrsqrt.f32 %v592_v62  ;;  %1305 = vmatprep.mubr.msk.f32.mxu1 %vm259_vm0, %v743_v9  ;;  %v706_v29 = vmul.f32 %v1839_v15, %v668_v59 }
 0x167   : > { %v1381_v7 = vpop.eup %1380  ;;  %v608_v40 = vadd.f32 1e-06, %v576_v11  ;;  %1282 = vmatmul.mubr.msk.f32.gmra.mrb[6].mxu0 %vm259_vm0, %v728_v14  ;;  %v691_v27 = vmul.f32 %v1839_v15, %v653_v28 }
 0x168   : > { %v593_v23 = vadd.f32 1e-06, %v561_v12  ;;  %v1383_v56 = vpop.eup %1382  ;;  %v539_v16 = vpop.xlane.xlu1 %538  ;;  %v744_v30 = vadd.f32 %v1845_v31, %v706_v29  ;;  %v669_v34 = vmul.f32 %v1381_v7, %v1730_v22 }
 0x169   : > { %v494_v25 = vpop.xlane.xlu0 %493  ;;  %1392 = vrsqrt.f32 %v608_v40  ;;  %v577_v13 = vmul.f32 0.020833334, %v539_v16  ;;  %v654_v19 = vmul.f32 %v1383_v56, %v1745_v42  ;;  %v729_v60 = vadd.f32 %v1845_v31, %v691_v27 }
 0x16a   : > { %v562_v35 = vmul.f32 0.020833334, %v494_v25  ;;  %1394 = vrsqrt.f32 %v593_v23  ;;  %1306 = vmatmul.mubr.msk.f32.gmra.mrb[6].mxu1 %vm259_vm0, %v744_v30  ;;  %v707_v1 = vmul.f32 %v1839_v15, %v669_v34 }
 0x16b   : > { %v1385_v61 = vpop.eup %1384  ;;  %v609_v2 = vadd.f32 1e-06, %v577_v13  ;;  %v692_v33 = vmul.f32 %v1839_v15, %v654_v19  ;;  %1284 = vmatprep.mubr.msk.f32.mxu0 %vm259_vm0, %v729_v60 }
 0x16c   : > { %v594_v44 = vadd.f32 1e-06, %v562_v35  ;;  %v1387_v38 = vpop.eup %1386  ;;  %v542_v22 = vpop.xlane.xlu1 %541  ;;  %v745_v10 = vadd.f32 %v1845_v31, %v707_v1  ;;  %v670_v42 = vmul.f32 %v1385_v61, %v1748_v20 }
 0x16d   : > { %v497_v39 = vpop.xlane.xlu0 %496  ;;  %1396 = vrsqrt.f32 %v609_v2  ;;  %v578_v46 = vmul.f32 0.020833334, %v542_v22  ;;  %v730_v5 = vadd.f32 %v1845_v31, %v692_v33  ;;  %v655_v17 = vmul.f32 %v1387_v38, %v1763_v63 }
 0x16e   : > { %v563_v47 = vmul.f32 0.020833334, %v497_v39  ;;  %1398 = vrsqrt.f32 %v594_v44  ;;  %1308 = vmatprep.mubr.msk.f32.mxu1 %vm259_vm0, %v745_v10  ;;  %v708_v50 = vmul.f32 %v1839_v15, %v670_v42 }
 0x16f   : > { %v1389_v51 = vpop.eup %1388  ;;  %v610_v55 = vadd.f32 1e-06, %v578_v46  ;;  %1285 = vmatmul.mubr.msk.f32.gmra.mrb[8].mxu0 %vm259_vm0, %v730_v5  ;;  %v693_v58 = vmul.f32 %v1839_v15, %v655_v17  ;;  %v1977_v5 = vld [vmem:[%s2089_s4] ss:$0 sm:$0xff] }
 0x170   : > { %v595_v48 = vadd.f32 1e-06, %v563_v47  ;;  %v1391_v8 = vpop.eup %1390  ;;  %v545_v43 = vpop.xlane.xlu1 %544  ;;  %v746_v36 = vadd.f32 %v1845_v31, %v708_v50  ;;  %v671_v37 = vmul.f32 %v1389_v51, %v1766_v3 }
 0x171   : > { %v500_v20 = vpop.xlane.xlu0 %499  ;;  %1400 = vrsqrt.f32 %v610_v55  ;;  %v579_v24 = vmul.f32 0.020833334, %v545_v43  ;;  %v656_v63 = vmul.f32 %v1391_v8, %v1775_v41  ;;  %v731_v26 = vadd.f32 %v1845_v31, %v693_v58 }
 0x172   : > { %v564_v62 = vmul.f32 0.020833334, %v500_v20  ;;  %1402 = vrsqrt.f32 %v595_v48  ;;  %1309 = vmatmul.mubr.msk.f32.gmra.mrb[8].mxu1 %vm259_vm0, %v746_v36  ;;  %v709_v4 = vmul.f32 %v1839_v15, %v671_v37 }
 0x173   : > { %v1393_v21 = vpop.eup %1392  ;;  %v611_v52 = vadd.f32 1e-06, %v579_v24  ;;  %v694_v59 = vmul.f32 %v1839_v15, %v656_v63  ;;  %1287 = vmatprep.mubr.msk.f32.mxu0 %vm259_vm0, %v731_v26 }
 0x174   : > { %v596_v9 = vadd.f32 1e-06, %v564_v62  ;;  %v1395_v11 = vpop.eup %1394  ;;  %v548_v3 = vpop.xlane.xlu1 %547  ;;  %v747_v12 = vadd.f32 %v1845_v31, %v709_v4  ;;  %v672_v41 = vmul.f32 %v1393_v21, %v1778_v18 }
 0x175   : > { %1404 = vrsqrt.f32 %v611_v52  ;;  %v580_v14 = vmul.f32 0.020833334, %v548_v3  ;;  %v732_v28 = vadd.f32 %v1845_v31, %v694_v59  ;;  %v657_v29 = vmul.f32 %v1395_v11, %v1787_v32 }
 0x176   : > { %1406 = vrsqrt.f32 %v596_v9  ;;  %1311 = vmatprep.mubr.msk.f32.mxu1 %vm259_vm0, %v747_v12  ;;  %v710_v7 = vmul.f32 %v1839_v15, %v672_v41 }
 0x177   : > { %v1397_v40 = vpop.eup %1396  ;;  %v612_v23 = vadd.f32 1e-06, %v580_v14  ;;  %1288 = vmatmul.mubr.msk.f32.gmra.mrb[10].mxu0 %vm259_vm0, %v732_v28  ;;  %v695_v56 = vmul.f32 %v1839_v15, %v657_v29 }
 0x178   : > { %v1399_v16 = vpop.eup %1398  ;;  %v748_v18 = vadd.f32 %v1845_v31, %v710_v7  ;;  %v673_v25 = vmul.f32 %v1397_v40, %v1790_v45 }
 0x179   : > { %1408 = vrsqrt.f32 %v612_v23  ;;  %v733_v27 = vadd.f32 %v1845_v31, %v695_v56  ;;  %v658_v32 = vmul.f32 %v1399_v16, %v1799_v54 }
 0x17a   : > { %1312 = vmatmul.mubr.msk.f32.gmra.mrb[10].mxu1 %vm259_vm0, %v748_v18  ;;  %v711_v30 = vmul.f32 %v1839_v15, %v673_v25 }
 0x17b   : > { %v1401_v34 = vpop.eup %1400  ;;  %1290 = vmatprep.mubr.msk.f32.mxu0 %vm259_vm0, %v733_v27  ;;  %v696_v13 = vmul.f32 %v1839_v15, %v658_v32 }
 0x17c   : > { %v1403_v35 = vpop.eup %1402  ;;  %v749_v19 = vadd.f32 %v1845_v31, %v711_v30  ;;  %v674_v60 = vmul.f32 %v1401_v34, %v1802_v49 }
 0x17d   : > { %v734_v45 = vadd.f32 %v1845_v31, %v696_v13  ;;  %v659_v1 = vmul.f32 %v1403_v35, %v1811_v6 }
 0x17e   : > { %1314 = vmatprep.mubr.msk.f32.mxu1 %vm259_vm0, %v749_v19  ;;  %v712_v54 = vmul.f32 %v1839_v15, %v674_v60 }
 0x17f   : > { %v1405_v61 = vpop.eup %1404  ;;  %1291 = vmatmul.mubr.msk.f32.gmra.mrb[12].mxu0 %vm259_vm0, %v734_v45  ;;  %v697_v2 = vmul.f32 %v1839_v15, %v659_v1 }
 0x180   : > { %v1407_v44 = vpop.eup %1406  ;;  %v750_v33 = vadd.f32 %v1845_v31, %v712_v54  ;;  %v675_v38 = vmul.f32 %v1405_v61, %v1814_v53 }
 0x181   : > { %v735_v49 = vadd.f32 %v1845_v31, %v697_v2  ;;  %v660_v22 = vmul.f32 %v1407_v44, %v1823_v0 }
 0x182   : > { %1315 = vmatmul.mubr.msk.f32.gmra.mrb[12].mxu1 %vm259_vm0, %v750_v33  ;;  %v713_v6 = vmul.f32 %v1839_v15, %v675_v38 }
 0x183   : > { %v1409_v39 = vpop.eup %1408  ;;  %1293 = vmatprep.mubr.msk.f32.mxu0 %vm259_vm0, %v735_v49  ;;  %v698_v10 = vmul.f32 %v1839_v15, %v660_v22 }
 0x184   : > { %v751_v42 = vadd.f32 %v1845_v31, %v713_v6  ;;  %v676_v46 = vmul.f32 %v1409_v39, %v1826_v57 }
 0x185   : > { %v736_v53 = vadd.f32 %v1845_v31, %v698_v10 }
 0x186   : > { %1317 = vmatprep.mubr.msk.f32.mxu1 %vm259_vm0, %v751_v42  ;;  %v714_v47 = vmul.f32 %v1839_v15, %v676_v46 }
 0x187   : > { %1294 = vmatmul.mubr.msk.f32.gmra.mrb[14].mxu0 %vm259_vm0, %v736_v53 }
 0x188   : > { %v752_v0 = vadd.f32 %v1845_v31, %v714_v47 }
 0x18a   : > { %1318 = vmatmul.mubr.msk.f32.gmra.mrb[14].mxu1 %vm259_vm0, %v752_v0 }
 0x222   : > { %v1274_v57 = vpop.f32.mrb[0].mxu0 }
 0x223   : > { %v934_v15 = vadd.f32 %v1274_v57, %v1977_v5  ;;  %v928_v31 = vpop.f32.mrb[1].mxu0 }
 0x224   : > { %v929_v17 = vadd.f32 %v1977_v5, %v928_v31 }
 0x225   : > { %1088 = vst.msk [vmem:[%s1984_s22 + $0x8] sm:$0xff] %vm259_vm0, %v934_v15  ;;  %v1298_v50 = vpop.f32.mrb[0].mxu1 }
 0x226   : > { %1087 = vst.msk [vmem:[%s1984_s22] sm:$0xff] %vm259_vm0, %v929_v17  ;;  %v1014_v51 = vadd.f32 %v1298_v50, %v1977_v5  ;;  %v1008_v55 = vpop.f32.mrb[1].mxu1 }
 0x227   : > { %v1009_v48 = vadd.f32 %v1977_v5, %v1008_v55 }
 0x228   : > { %1104 = vst.msk [vmem:[%s1984_s22 + $0x88] sm:$0xff] %vm259_vm0, %v1014_v51 }
 0x229   : > { %1103 = vst.msk [vmem:[%s1984_s22 + $0x80] sm:$0xff] %vm259_vm0, %v1009_v48 }
 0x22a   : > { %v1277_v8 = vpop.f32.mrb[2].mxu0 }
 0x22b   : > { %v944_v43 = vadd.f32 %v1277_v8, %v1977_v5  ;;  %v938_v20 = vpop.f32.mrb[3].mxu0 }
 0x22c   : > { %v939_v58 = vadd.f32 %v1977_v5, %v938_v20 }
 0x22d   : > { %1090 = vst.msk [vmem:[%s1984_s22 + $0x18] sm:$0xff] %vm259_vm0, %v944_v43  ;;  %v1301_v36 = vpop.f32.mrb[2].mxu1 }
 0x22e   : > { %1089 = vst.msk [vmem:[%s1984_s22 + $0x10] sm:$0xff] %vm259_vm0, %v939_v58  ;;  %v1024_v37 = vadd.f32 %v1301_v36, %v1977_v5  ;;  %v1018_v24 = vpop.f32.mrb[3].mxu1 }
 0x22f   : > { %v1019_v62 = vadd.f32 %v1977_v5, %v1018_v24 }
 0x230   : > { %1106 = vst.msk [vmem:[%s1984_s22 + $0x98] sm:$0xff] %vm259_vm0, %v1024_v37 }
 0x231   : > { %1105 = vst.msk [vmem:[%s1984_s22 + $0x90] sm:$0xff] %vm259_vm0, %v1019_v62 }
 0x232   : > { %v1280_v63 = vpop.f32.mrb[4].mxu0 }
 0x233   : > { %v954_v26 = vadd.f32 %v1280_v63, %v1977_v5  ;;  %v948_v4 = vpop.f32.mrb[5].mxu0 }
 0x234   : > { %v949_v21 = vadd.f32 %v1977_v5, %v948_v4 }
 0x235   : > { %1092 = vst.msk [vmem:[%s1984_s22 + $0x28] sm:$0xff] %vm259_vm0, %v954_v26  ;;  %v1304_v52 = vpop.f32.mrb[4].mxu1 }
 0x236   : > { %1091 = vst.msk [vmem:[%s1984_s22 + $0x20] sm:$0xff] %vm259_vm0, %v949_v21  ;;  %v1034_v9 = vadd.f32 %v1304_v52, %v1977_v5  ;;  %v1028_v59 = vpop.f32.mrb[5].mxu1 }
 0x237   : > { %v1029_v11 = vadd.f32 %v1977_v5, %v1028_v59 }
 0x238   : > { %1108 = vst.msk [vmem:[%s1984_s22 + $0xa8] sm:$0xff] %vm259_vm0, %v1034_v9 }
 0x239   : > { %1107 = vst.msk [vmem:[%s1984_s22 + $0xa0] sm:$0xff] %vm259_vm0, %v1029_v11 }
 0x23a   : > { %v1283_v3 = vpop.f32.mrb[6].mxu0 }
 0x23b   : > { %v964_v12 = vadd.f32 %v1283_v3, %v1977_v5  ;;  %v958_v41 = vpop.f32.mrb[7].mxu0 }
 0x23c   : > { %v959_v14 = vadd.f32 %v1977_v5, %v958_v41 }
 0x23d   : > { %1094 = vst.msk [vmem:[%s1984_s22 + $0x38] sm:$0xff] %vm259_vm0, %v964_v12  ;;  %v1307_v28 = vpop.f32.mrb[6].mxu1 }
 0x23e   : > { %1093 = vst.msk [vmem:[%s1984_s22 + $0x30] sm:$0xff] %vm259_vm0, %v959_v14  ;;  %v1044_v29 = vadd.f32 %v1307_v28, %v1977_v5  ;;  %v1038_v7 = vpop.f32.mrb[7].mxu1 }
 0x23f   : > { %v1039_v40 = vadd.f32 %v1977_v5, %v1038_v7 }
 0x240   : > { %1110 = vst.msk [vmem:[%s1984_s22 + $0xb8] sm:$0xff] %vm259_vm0, %v1044_v29 }
 0x241   : > { %1109 = vst.msk [vmem:[%s1984_s22 + $0xb0] sm:$0xff] %vm259_vm0, %v1039_v40 }
 0x242   : > { %v1286_v23 = vpop.f32.mrb[8].mxu0 }
 0x243   : > { %v974_v56 = vadd.f32 %v1286_v23, %v1977_v5  ;;  %v968_v16 = vpop.f32.mrb[9].mxu0 }
 0x244   : > { %v969_v18 = vadd.f32 %v1977_v5, %v968_v16 }
 0x245   : > { %1096 = vst.msk [vmem:[%s1984_s22 + $0x48] sm:$0xff] %vm259_vm0, %v974_v56  ;;  %v1310_v25 = vpop.f32.mrb[8].mxu1 }
 0x246   : > { %1095 = vst.msk [vmem:[%s1984_s22 + $0x40] sm:$0xff] %vm259_vm0, %v969_v18  ;;  %v1054_v27 = vadd.f32 %v1310_v25, %v1977_v5  ;;  %v1048_v32 = vpop.f32.mrb[9].mxu1 }
 0x247   : > { %v1049_v30 = vadd.f32 %v1977_v5, %v1048_v32 }
 0x248   : > { %1112 = vst.msk [vmem:[%s1984_s22 + $0xc8] sm:$0xff] %vm259_vm0, %v1054_v27 }
 0x249   : > { %1111 = vst.msk [vmem:[%s1984_s22 + $0xc0] sm:$0xff] %vm259_vm0, %v1049_v30 }
 0x24a   : > { %v1289_v34 = vpop.f32.mrb[10].mxu0 }
 0x24b   : > { %v984_v13 = vadd.f32 %v1289_v34, %v1977_v5  ;;  %v978_v35 = vpop.f32.mrb[11].mxu0 }
 0x24c   : > { %v979_v19 = vadd.f32 %v1977_v5, %v978_v35 }
 0x24d   : > { %1098 = vst.msk [vmem:[%s1984_s22 + $0x58] sm:$0xff] %vm259_vm0, %v984_v13  ;;  %v1313_v60 = vpop.f32.mrb[10].mxu1 }
 0x24e   : > { %1097 = vst.msk [vmem:[%s1984_s22 + $0x50] sm:$0xff] %vm259_vm0, %v979_v19  ;;  %v1064_v45 = vadd.f32 %v1313_v60, %v1977_v5  ;;  %v1058_v1 = vpop.f32.mrb[11].mxu1 }
 0x24f   : > { %v1059_v54 = vadd.f32 %v1977_v5, %v1058_v1 }
 0x250   : > { %1114 = vst.msk [vmem:[%s1984_s22 + $0xd8] sm:$0xff] %vm259_vm0, %v1064_v45 }
 0x251   : > { %1113 = vst.msk [vmem:[%s1984_s22 + $0xd0] sm:$0xff] %vm259_vm0, %v1059_v54 }
 0x252   : > { %v1292_v61 = vpop.f32.mrb[12].mxu0 }
 0x253   : > { %v994_v2 = vadd.f32 %v1292_v61, %v1977_v5  ;;  %v988_v44 = vpop.f32.mrb[13].mxu0 }
 0x254   : > { %v989_v33 = vadd.f32 %v1977_v5, %v988_v44 }
 0x255   : > { %1100 = vst.msk [vmem:[%s1984_s22 + $0x68] sm:$0xff] %vm259_vm0, %v994_v2  ;;  %v1316_v38 = vpop.f32.mrb[12].mxu1 }
 0x256   : > { %1099 = vst.msk [vmem:[%s1984_s22 + $0x60] sm:$0xff] %vm259_vm0, %v989_v33  ;;  %v1074_v49 = vadd.f32 %v1316_v38, %v1977_v5  ;;  %v1068_v22 = vpop.f32.mrb[13].mxu1 }
 0x257   : > { %v1069_v6 = vadd.f32 %v1977_v5, %v1068_v22 }
 0x258   : > { %1116 = vst.msk [vmem:[%s1984_s22 + $0xe8] sm:$0xff] %vm259_vm0, %v1074_v49 }
 0x259   : > { %1115 = vst.msk [vmem:[%s1984_s22 + $0xe0] sm:$0xff] %vm259_vm0, %v1069_v6 }
 0x25a   : > { %v1295_v39 = vpop.f32.mrb[14].mxu0 }
 0x25b   : > { %v1004_v10 = vadd.f32 %v1295_v39, %v1977_v5  ;;  %v998_v42 = vpop.f32.mrb[15].mxu0 }
 0x25c   : > { %v999_v46 = vadd.f32 %v1977_v5, %v998_v42 }
 0x25d   : > { %1102 = vst.msk [vmem:[%s1984_s22 + $0x78] sm:$0xff] %vm259_vm0, %v1004_v10  ;;  %v1319_v53 = vpop.f32.mrb[14].mxu1 }
 0x25e   : > { %1101 = vst.msk [vmem:[%s1984_s22 + $0x70] sm:$0xff] %vm259_vm0, %v999_v46  ;;  %v1084_v47 = vadd.f32 %v1319_v53, %v1977_v5  ;;  %v1078_v0 = vpop.f32.mrb[15].mxu1 }
 0x25f   : > { %v1079_v57 = vadd.f32 %v1977_v5, %v1078_v0 }
 0x260   : > { %1118 = vst.msk [vmem:[%s1984_s22 + $0xf8] sm:$0xff] %vm259_vm0, %v1084_v47 }
 0x261   : > { %1117 = vst.msk [vmem:[%s1984_s22 + $0xf0] sm:$0xff] %vm259_vm0, %v1079_v57 }
 0x262 PF: > { %s15_s18 = sadd.s32 1, %s1416_s18  }
 0x263   : > { %p12_p4 = scmp.ge.s32.totalorder %s15_s18, 4  }
 0x265   :  { %14 = sbr.rel (!%p12_p4) target bundleno = 1 (0x1), region = 70 }

</bundles_post_ra>
